<compile_context>
chip_gen: v5e
topology: v5e:2x2
jax: 0.10.0
libtpu: 0.0.40
codegen_flags: <defaults>
</compile_context>

<pallas_src>
import math

import jax
import jax.numpy as jnp
from jax.experimental import pallas as pl
from jax.experimental.pallas import tpu as pltpu

# ----------------------------- config ---------------------------------------
BATCH = 2
SEQ = 8
HIDDEN = 32
NUM_HEADS = 4
HEAD_DIM = HIDDEN // NUM_HEADS            # 8
SCALE = 1.0 / math.sqrt(HEAD_DIM)

# MXU operand dtype (review item 2): bf16 operands, f32 accumulation everywhere.
MXU_DTYPE = jnp.bfloat16

# Tile sizes.  At production shapes use multiples of 256 (v6e/v7x MXU) / 128 (v5e);
# the toy L=8, E=32 fit in a single tile per axis.
TR = SEQ          # projection row tile        (prod: 256)
TQ = SEQ          # attention q-tile rows      (prod: 256)
TK = SEQ          # attention kv-tile rows     (prod: 256..1024)

# Explicit scoped-VMEM limit (review): re-derive per generation
# (physical: 128 MiB v5e/v6e, 64 MiB v7x; defaults are only 16/32/32 MiB).
VMEM_LIMIT_BYTES = 64 * 1024 * 1024


# ----------------------------- stage 1: fused QKV projection -----------------
def qkv_proj_kernel(h_ref, wqkv_ref, bqkv_ref, q_ref, k_ref, v_ref):
    # h_ref    : (TR, E)      f32 hidden rows of one batch element
    # wqkv_ref : (E, 3E)      bf16 [scale*Wq | Wk | Wv]   (scale folded offline)
    # bqkv_ref : (1, 3E)      f32  [scale*bq | bk | bv]
    # q/k/v_ref: (H, TR, D)   bf16, heads-leading layout consumed by the flash kernel
    qkv = jnp.dot(h_ref[...].astype(MXU_DTYPE), wqkv_ref[...],
                  preferred_element_type=jnp.float32) + bqkv_ref[...]      # (TR, 3E) f32
    qkv = qkv.astype(MXU_DTYPE)

    # Layout scatter only (no matmuls): split heads onto the leading axis.
    # At production D (multiple of 128) these slices/stores are lane-aligned.
    for h in range(NUM_HEADS):                    # static unroll (H small)
        lo = h * HEAD_DIM
        q_ref[h] = qkv[:, lo:lo + HEAD_DIM]
        k_ref[h] = qkv[:, HIDDEN + lo:HIDDEN + lo + HEAD_DIM]
        v_ref[h] = qkv[:, 2 * HIDDEN + lo:2 * HIDDEN + lo + HEAD_DIM]


# ----------------------------- stage 2: flash attention + output proj --------
def flash_attn_kernel(q_ref, k_ref, v_ref, mask_ref, wo_ref, bo_ref, o_ref,
                      m_sc, l_sc, acc_sc, omerge_sc):
    # q_ref  : (H, TQ, D) bf16     k_ref, v_ref : (H, TK, D) bf16
    # mask_ref: (TQ, TK) f32 additive mask tile (broadcast over heads)
    # wo_ref : (E, E) bf16 (resident)   bo_ref : (1, E) f32 (resident)
    # o_ref  : (TQ, E) f32
    # scratch: m_sc, l_sc (H, TQ, 1) f32; acc_sc (H, TQ, D) f32; omerge_sc (TQ, E) f32
    kv = pl.program_id(2)

    @pl.when(kv == 0)
    def _init():
        m_sc[...] = jnp.full_like(m_sc[...], -jnp.inf)
        l_sc[...] = jnp.zeros_like(l_sc[...])
        acc_sc[...] = jnp.zeros_like(acc_sc[...])

    q = q_ref[...]                                # heads-leading, no in-kernel relayout
    k = k_ref[...]
    v = v_ref[...]

    # ONE head-batched MXU einsum for the scores (1/sqrt(D) already folded into Wq).
    s = jnp.einsum('hqd,hkd->hqk', q, k,
                   preferred_element_type=jnp.float32)          # (H, TQ, TK) f32
    s = s + mask_ref[...]                                       # mask broadcasts over H

    # Online softmax update, all in f32 (v5e VPU/EUP have no bf16).
    m_prev = m_sc[...]
    m_new = jnp.maximum(m_prev, jnp.max(s, axis=-1, keepdims=True))
    alpha = jnp.exp(m_prev - m_new)
    p = jnp.exp(s - m_new)
    l_sc[...] = alpha * l_sc[...] + jnp.sum(p, axis=-1, keepdims=True)
    acc_sc[...] = alpha * acc_sc[...] + jnp.einsum(
        'hqk,hkd->hqd', p.astype(MXU_DTYPE), v,
        preferred_element_type=jnp.float32)                     # (H, TQ, D) f32
    m_sc[...] = m_new

    @pl.when(kv == pl.num_programs(2) - 1)
    def _finalize():
        # Normalize with the EUP approximate reciprocal (free slot).
        o = acc_sc[...] * pl.reciprocal(l_sc[...], approx=True)     # (H, TQ, D)
        # Head concat into lane-major (TQ, E) scratch (store-only; lane-aligned at
        # production D), then ONE output-projection matmul (MRB-friendly on v7x).
        for h in range(NUM_HEADS):                                   # static unroll
            omerge_sc[:, h * HEAD_DIM:(h + 1) * HEAD_DIM] = o[h]
        out = jnp.dot(omerge_sc[...].astype(MXU_DTYPE), wo_ref[...],
                      preferred_element_type=jnp.float32) + bo_ref[...]
        o_ref[...] = out.astype(o_ref.dtype)


# ----------------------------- wrapper ---------------------------------------
def prepare_params(wq, bq, wk, bk, wv, bv, wo, bo):
    """One-time parameter prep (load time, not per call): fold the 1/sqrt(D) scale
    into Wq/bq BEFORE the bf16 cast, fuse Q|K|V into one (E, 3E) weight, cast MXU
    operands to bf16; biases stay f32 (added after the f32 accumulation)."""
    w_qkv = jnp.concatenate([wq * SCALE, wk, wv], axis=1).astype(MXU_DTYPE)   # (E, 3E)
    b_qkv = jnp.concatenate([bq * SCALE, bk, bv], axis=1).astype(jnp.float32)  # (1, 3E)
    return w_qkv, b_qkv, wo.astype(MXU_DTYPE), bo.astype(jnp.float32)


@jax.jit
def decoder_attention(hidden_state, attention_mask, w_qkv, b_qkv, w_o, b_o):
    B, L, E = hidden_state.shape
    # Mask is assumed head-broadcast (B, 1, L, L); squeeze the head dim.
    mask3 = attention_mask.reshape(B, L, L)

    # ---- stage 1: fused QKV projection, heads-leading bf16 outputs ----
    qkv_shape = jax.ShapeDtypeStruct((B, NUM_HEADS, L, HEAD_DIM), MXU_DTYPE)
    q, k, v = pl.pallas_call(
        qkv_proj_kernel,
        out_shape=(qkv_shape, qkv_shape, qkv_shape),
        grid=(B, L // TR),
        in_specs=[
            pl.BlockSpec((None, TR, E), lambda b, r: (b, r, 0)),
            pl.BlockSpec((E, 3 * E), lambda b, r: (0, 0)),       # resident weights
            pl.BlockSpec((1, 3 * E), lambda b, r: (0, 0)),
        ],
        out_specs=[
            pl.BlockSpec((None, NUM_HEADS, TR, HEAD_DIM), lambda b, r: (b, 0, r, 0)),
            pl.BlockSpec((None, NUM_HEADS, TR, HEAD_DIM), lambda b, r: (b, 0, r, 0)),
            pl.BlockSpec((None, NUM_HEADS, TR, HEAD_DIM), lambda b, r: (b, 0, r, 0)),
        ],
        compiler_params=pltpu.CompilerParams(
            dimension_semantics=("parallel", "parallel"),
            vmem_limit_bytes=VMEM_LIMIT_BYTES),
    )(hidden_state, w_qkv, b_qkv)

    # ---- stage 2: flash-style attention + fused output projection ----
    out = pl.pallas_call(
        flash_attn_kernel,
        out_shape=jax.ShapeDtypeStruct((B, L, E), jnp.float32),
        grid=(B, L // TQ, L // TK),
        in_specs=[
            pl.BlockSpec((None, NUM_HEADS, TQ, HEAD_DIM), lambda b, qi, ki: (b, 0, qi, 0)),
            pl.BlockSpec((None, NUM_HEADS, TK, HEAD_DIM), lambda b, qi, ki: (b, 0, ki, 0)),
            pl.BlockSpec((None, NUM_HEADS, TK, HEAD_DIM), lambda b, qi, ki: (b, 0, ki, 0)),
            pl.BlockSpec((None, TQ, TK), lambda b, qi, ki: (b, qi, ki)),
            pl.BlockSpec((E, E), lambda b, qi, ki: (0, 0)),       # resident Wo
            pl.BlockSpec((1, E), lambda b, qi, ki: (0, 0)),       # resident bo
        ],
        out_specs=pl.BlockSpec((None, TQ, E), lambda b, qi, ki: (b, qi, 0)),
        scratch_shapes=[
            pltpu.VMEM((NUM_HEADS, TQ, 1), jnp.float32),          # running max
            pltpu.VMEM((NUM_HEADS, TQ, 1), jnp.float32),          # running denominator
            pltpu.VMEM((NUM_HEADS, TQ, HEAD_DIM), jnp.float32),   # output accumulator
            pltpu.VMEM((TQ, HIDDEN), jnp.float32),                # head-concat buffer
        ],
        compiler_params=pltpu.CompilerParams(
            dimension_semantics=("parallel", "parallel", "arbitrary"),
            vmem_limit_bytes=VMEM_LIMIT_BYTES),
    )(q, k, v, mask3, w_o, b_o)

    return out


# ----------------------------- reference (plain JAX, f32) ---------------------
def reference(hidden_state, attention_mask, wq, bq, wk, bk, wv, bv, wo, bo):
    B, L, E = hidden_state.shape
    q = hidden_state @ wq + bq
    k = hidden_state @ wk + bk
    v = hidden_state @ wv + bv

    def split(x):
        return x.reshape(B, L, NUM_HEADS, HEAD_DIM).transpose(0, 2, 1, 3)

    q, k, v = split(q), split(k), split(v)
    s = jnp.einsum('bhqd,bhkd->bhqk', q, k) * SCALE + attention_mask
    p = jax.nn.softmax(s, axis=-1)
    o = jnp.einsum('bhqk,bhkd->bhqd', p, v)
    o = o.transpose(0, 2, 1, 3).reshape(B, L, E)
    return o @ wo + bo


# ----------------------------- main ------------------------------------------
if __name__ == "__main__":
    key = jax.random.PRNGKey(0)
    ks = jax.random.split(key, 9)

    hidden_state = jax.random.normal(ks[0], (BATCH, SEQ, HIDDEN), jnp.float32)

    # Causal additive mask, shape (B, 1, L, L): 0 where attended, -1e9 elsewhere.
    causal = jnp.tril(jnp.ones((SEQ, SEQ), jnp.float32))
    attention_mask = jnp.where(causal[None, None, :, :] > 0, 0.0, -1e9)
    attention_mask = jnp.broadcast_to(attention_mask, (BATCH, 1, SEQ, SEQ)).astype(jnp.float32)

    def init_linear(kw, kb, fan_in, fan_out):
        # deterministic small-scale init; stored as (in, out), i.e. x @ W + b
        w = jax.random.normal(kw, (fan_in, fan_out), jnp.float32) * 0.05
        b = jax.random.normal(kb, (1, fan_out), jnp.float32) * 0.05
        return w, b

    wq, bq = init_linear(ks[1], ks[2], HIDDEN, HIDDEN)
    wk, bk = init_linear(ks[3], ks[4], HIDDEN, HIDDEN)
    wv, bv = init_linear(ks[5], ks[6], HIDDEN, HIDDEN)
    wo, bo = init_linear(ks[7], ks[8], HIDDEN, HIDDEN)

    params = prepare_params(wq, bq, wk, bk, wv, bv, wo, bo)

    out = decoder_attention(hidden_state, attention_mask, *params)
    out = jax.block_until_ready(out)

    ref = reference(hidden_state, attention_mask, wq, bq, wk, bk, wv, bv, wo, bo)
    # Tolerance covers bf16 MXU operands (f32 accumulation) and the EUP approximate
    # reciprocal; structural errors would be O(output magnitude) and are still caught.
    if not jnp.allclose(out, ref, rtol=2e-2, atol=2e-2):
        max_err = float(jnp.max(jnp.abs(out - ref)))
        raise AssertionError(
            f"Pallas kernel output does not match JAX reference (max abs err {max_err})")

    print("KERNEL_OK")
</pallas_src>

<mosaic_0001>
module attributes {stable_mosaic.version = 11 : i64} {
  func.func @qkv_proj_kernel(%arg0: i32, %arg1: i32, %arg2: memref<1x8x32xf32, #tpu.memory_space<vmem>>, %arg3: memref<32x96xbf16, #tpu.memory_space<vmem>>, %arg4: memref<1x96xf32, #tpu.memory_space<vmem>>, %arg5: memref<1x4x8x8xbf16, #tpu.memory_space<vmem>>, %arg6: memref<1x4x8x8xbf16, #tpu.memory_space<vmem>>, %arg7: memref<1x4x8x8xbf16, #tpu.memory_space<vmem>>) attributes {dimension_semantics = [#tpu.dimension_semantics<parallel>, #tpu.dimension_semantics<parallel>], iteration_bounds = array<i64: 2, 1>, scalar_prefetch = 0 : i64, scratch_operands = 0 : i64, tpu.core_type = #tpu.core_type<tc>, window_params = [{transform_indices = @transform_0, window_bounds = array<i64: 1, 8, 32>}, {pipeline_mode = #tpu.pipeline_mode<synchronous>, transform_indices = @transform_1, window_bounds = array<i64: 32, 96>}, {pipeline_mode = #tpu.pipeline_mode<synchronous>, transform_indices = @transform_2, window_bounds = array<i64: 1, 96>}, {transform_indices = @transform_3, window_bounds = array<i64: 1, 4, 8, 8>}, {transform_indices = @transform_4, window_bounds = array<i64: 1, 4, 8, 8>}, {transform_indices = @transform_5, window_bounds = array<i64: 1, 4, 8, 8>}]} {
    %c0 = arith.constant 0 : index
    %c0_0 = arith.constant 0 : index
    %c0_1 = arith.constant 0 : index
    %0 = vector.load %arg2[%c0, %c0_0, %c0_1] : memref<1x8x32xf32, #tpu.memory_space<vmem>>, vector<1x8x32xf32>
    %1 = vector.shape_cast %0 : vector<1x8x32xf32> to vector<8x32xf32>
    %2 = arith.truncf %1 : vector<8x32xf32> to vector<8x32xbf16>
    %c0_2 = arith.constant 0 : index
    %c0_3 = arith.constant 0 : index
    %3 = vector.load %arg3[%c0_2, %c0_3] : memref<32x96xbf16, #tpu.memory_space<vmem>>, vector<32x96xbf16>
    %cst = arith.constant dense<0.000000e+00> : vector<8x96xf32>
    %4 = tpu.matmul %2, %3, %cst {dimension_numbers = #tpu.dot_dimension_numbers<[1], [0], [0], [1], [0, 0, 1, 1], [], []>} : vector<8x32xbf16>, vector<32x96xbf16>, vector<8x96xf32> -> vector<8x96xf32>
    %c0_4 = arith.constant 0 : index
    %c0_5 = arith.constant 0 : index
    %5 = vector.load %arg4[%c0_4, %c0_5] : memref<1x96xf32, #tpu.memory_space<vmem>>, vector<1x96xf32>
    %6 = vector.broadcast %5 : vector<1x96xf32> to vector<8x96xf32>
    %7 = arith.addf %4, %6 : vector<8x96xf32>
    %8 = arith.truncf %7 : vector<8x96xf32> to vector<8x96xbf16>
    %9 = vector.extract_strided_slice %8 {offsets = [0, 0], sizes = [8, 8], strides = [1, 1]} : vector<8x96xbf16> to vector<8x8xbf16>
    %c0_6 = arith.constant 0 : index
    %c0_7 = arith.constant 0 : index
    %c0_8 = arith.constant 0 : index
    %c0_9 = arith.constant 0 : index
    %10 = vector.load %arg5[%c0_6, %c0_7, %c0_8, %c0_9] : memref<1x4x8x8xbf16, #tpu.memory_space<vmem>>, vector<1x1x8x8xbf16>
    %11 = vector.shape_cast %10 : vector<1x1x8x8xbf16> to vector<8x8xbf16>
    %12 = vector.shape_cast %9 : vector<8x8xbf16> to vector<1x1x8x8xbf16>
    tpu.vector_store %arg5[%c0_6, %c0_7, %c0_8, %c0_9], %12 {strides = array<i32>} : memref<1x4x8x8xbf16, #tpu.memory_space<vmem>>, vector<1x1x8x8xbf16>,
    %13 = vector.extract_strided_slice %8 {offsets = [0, 32], sizes = [8, 8], strides = [1, 1]} : vector<8x96xbf16> to vector<8x8xbf16>
    %c0_10 = arith.constant 0 : index
    %c0_11 = arith.constant 0 : index
    %c0_12 = arith.constant 0 : index
    %c0_13 = arith.constant 0 : index
    %14 = vector.load %arg6[%c0_10, %c0_11, %c0_12, %c0_13] : memref<1x4x8x8xbf16, #tpu.memory_space<vmem>>, vector<1x1x8x8xbf16>
    %15 = vector.shape_cast %14 : vector<1x1x8x8xbf16> to vector<8x8xbf16>
    %16 = vector.shape_cast %13 : vector<8x8xbf16> to vector<1x1x8x8xbf16>
    tpu.vector_store %arg6[%c0_10, %c0_11, %c0_12, %c0_13], %16 {strides = array<i32>} : memref<1x4x8x8xbf16, #tpu.memory_space<vmem>>, vector<1x1x8x8xbf16>,
    %17 = vector.extract_strided_slice %8 {offsets = [0, 64], sizes = [8, 8], strides = [1, 1]} : vector<8x96xbf16> to vector<8x8xbf16>
    %c0_14 = arith.constant 0 : index
    %c0_15 = arith.constant 0 : index
    %c0_16 = arith.constant 0 : index
    %c0_17 = arith.constant 0 : index
    %18 = vector.load %arg7[%c0_14, %c0_15, %c0_16, %c0_17] : memref<1x4x8x8xbf16, #tpu.memory_space<vmem>>, vector<1x1x8x8xbf16>
    %19 = vector.shape_cast %18 : vector<1x1x8x8xbf16> to vector<8x8xbf16>
    %20 = vector.shape_cast %17 : vector<8x8xbf16> to vector<1x1x8x8xbf16>
    tpu.vector_store %arg7[%c0_14, %c0_15, %c0_16, %c0_17], %20 {strides = array<i32>} : memref<1x4x8x8xbf16, #tpu.memory_space<vmem>>, vector<1x1x8x8xbf16>,
    %21 = vector.extract_strided_slice %8 {offsets = [0, 8], sizes = [8, 8], strides = [1, 1]} : vector<8x96xbf16> to vector<8x8xbf16>
    %c0_18 = arith.constant 0 : index
    %c1 = arith.constant 1 : index
    %c0_19 = arith.constant 0 : index
    %c0_20 = arith.constant 0 : index
    %22 = vector.load %arg5[%c0_18, %c1, %c0_19, %c0_20] : memref<1x4x8x8xbf16, #tpu.memory_space<vmem>>, vector<1x1x8x8xbf16>
    %23 = vector.shape_cast %22 : vector<1x1x8x8xbf16> to vector<8x8xbf16>
    %24 = vector.shape_cast %21 : vector<8x8xbf16> to vector<1x1x8x8xbf16>
    tpu.vector_store %arg5[%c0_18, %c1, %c0_19, %c0_20], %24 {strides = array<i32>} : memref<1x4x8x8xbf16, #tpu.memory_space<vmem>>, vector<1x1x8x8xbf16>,
    %25 = vector.extract_strided_slice %8 {offsets = [0, 40], sizes = [8, 8], strides = [1, 1]} : vector<8x96xbf16> to vector<8x8xbf16>
    %c0_21 = arith.constant 0 : index
    %c1_22 = arith.constant 1 : index
    %c0_23 = arith.constant 0 : index
    %c0_24 = arith.constant 0 : index
    %26 = vector.load %arg6[%c0_21, %c1_22, %c0_23, %c0_24] : memref<1x4x8x8xbf16, #tpu.memory_space<vmem>>, vector<1x1x8x8xbf16>
    %27 = vector.shape_cast %26 : vector<1x1x8x8xbf16> to vector<8x8xbf16>
    %28 = vector.shape_cast %25 : vector<8x8xbf16> to vector<1x1x8x8xbf16>
    tpu.vector_store %arg6[%c0_21, %c1_22, %c0_23, %c0_24], %28 {strides = array<i32>} : memref<1x4x8x8xbf16, #tpu.memory_space<vmem>>, vector<1x1x8x8xbf16>,
    %29 = vector.extract_strided_slice %8 {offsets = [0, 72], sizes = [8, 8], strides = [1, 1]} : vector<8x96xbf16> to vector<8x8xbf16>
    %c0_25 = arith.constant 0 : index
    %c1_26 = arith.constant 1 : index
    %c0_27 = arith.constant 0 : index
    %c0_28 = arith.constant 0 : index
    %30 = vector.load %arg7[%c0_25, %c1_26, %c0_27, %c0_28] : memref<1x4x8x8xbf16, #tpu.memory_space<vmem>>, vector<1x1x8x8xbf16>
    %31 = vector.shape_cast %30 : vector<1x1x8x8xbf16> to vector<8x8xbf16>
    %32 = vector.shape_cast %29 : vector<8x8xbf16> to vector<1x1x8x8xbf16>
    tpu.vector_store %arg7[%c0_25, %c1_26, %c0_27, %c0_28], %32 {strides = array<i32>} : memref<1x4x8x8xbf16, #tpu.memory_space<vmem>>, vector<1x1x8x8xbf16>,
    %33 = vector.extract_strided_slice %8 {offsets = [0, 16], sizes = [8, 8], strides = [1, 1]} : vector<8x96xbf16> to vector<8x8xbf16>
    %c0_29 = arith.constant 0 : index
    %c2 = arith.constant 2 : index
    %c0_30 = arith.constant 0 : index
    %c0_31 = arith.constant 0 : index
    %34 = vector.load %arg5[%c0_29, %c2, %c0_30, %c0_31] : memref<1x4x8x8xbf16, #tpu.memory_space<vmem>>, vector<1x1x8x8xbf16>
    %35 = vector.shape_cast %34 : vector<1x1x8x8xbf16> to vector<8x8xbf16>
    %36 = vector.shape_cast %33 : vector<8x8xbf16> to vector<1x1x8x8xbf16>
    tpu.vector_store %arg5[%c0_29, %c2, %c0_30, %c0_31], %36 {strides = array<i32>} : memref<1x4x8x8xbf16, #tpu.memory_space<vmem>>, vector<1x1x8x8xbf16>,
    %37 = vector.extract_strided_slice %8 {offsets = [0, 48], sizes = [8, 8], strides = [1, 1]} : vector<8x96xbf16> to vector<8x8xbf16>
    %c0_32 = arith.constant 0 : index
    %c2_33 = arith.constant 2 : index
    %c0_34 = arith.constant 0 : index
    %c0_35 = arith.constant 0 : index
    %38 = vector.load %arg6[%c0_32, %c2_33, %c0_34, %c0_35] : memref<1x4x8x8xbf16, #tpu.memory_space<vmem>>, vector<1x1x8x8xbf16>
    %39 = vector.shape_cast %38 : vector<1x1x8x8xbf16> to vector<8x8xbf16>
    %40 = vector.shape_cast %37 : vector<8x8xbf16> to vector<1x1x8x8xbf16>
    tpu.vector_store %arg6[%c0_32, %c2_33, %c0_34, %c0_35], %40 {strides = array<i32>} : memref<1x4x8x8xbf16, #tpu.memory_space<vmem>>, vector<1x1x8x8xbf16>,
    %41 = vector.extract_strided_slice %8 {offsets = [0, 80], sizes = [8, 8], strides = [1, 1]} : vector<8x96xbf16> to vector<8x8xbf16>
    %c0_36 = arith.constant 0 : index
    %c2_37 = arith.constant 2 : index
    %c0_38 = arith.constant 0 : index
    %c0_39 = arith.constant 0 : index
    %42 = vector.load %arg7[%c0_36, %c2_37, %c0_38, %c0_39] : memref<1x4x8x8xbf16, #tpu.memory_space<vmem>>, vector<1x1x8x8xbf16>
    %43 = vector.shape_cast %42 : vector<1x1x8x8xbf16> to vector<8x8xbf16>
    %44 = vector.shape_cast %41 : vector<8x8xbf16> to vector<1x1x8x8xbf16>
    tpu.vector_store %arg7[%c0_36, %c2_37, %c0_38, %c0_39], %44 {strides = array<i32>} : memref<1x4x8x8xbf16, #tpu.memory_space<vmem>>, vector<1x1x8x8xbf16>,
    %45 = vector.extract_strided_slice %8 {offsets = [0, 24], sizes = [8, 8], strides = [1, 1]} : vector<8x96xbf16> to vector<8x8xbf16>
    %c0_40 = arith.constant 0 : index
    %c3 = arith.constant 3 : index
    %c0_41 = arith.constant 0 : index
    %c0_42 = arith.constant 0 : index
    %46 = vector.load %arg5[%c0_40, %c3, %c0_41, %c0_42] : memref<1x4x8x8xbf16, #tpu.memory_space<vmem>>, vector<1x1x8x8xbf16>
    %47 = vector.shape_cast %46 : vector<1x1x8x8xbf16> to vector<8x8xbf16>
    %48 = vector.shape_cast %45 : vector<8x8xbf16> to vector<1x1x8x8xbf16>
    tpu.vector_store %arg5[%c0_40, %c3, %c0_41, %c0_42], %48 {strides = array<i32>} : memref<1x4x8x8xbf16, #tpu.memory_space<vmem>>, vector<1x1x8x8xbf16>,
    %49 = vector.extract_strided_slice %8 {offsets = [0, 56], sizes = [8, 8], strides = [1, 1]} : vector<8x96xbf16> to vector<8x8xbf16>
    %c0_43 = arith.constant 0 : index
    %c3_44 = arith.constant 3 : index
    %c0_45 = arith.constant 0 : index
    %c0_46 = arith.constant 0 : index
    %50 = vector.load %arg6[%c0_43, %c3_44, %c0_45, %c0_46] : memref<1x4x8x8xbf16, #tpu.memory_space<vmem>>, vector<1x1x8x8xbf16>
    %51 = vector.shape_cast %50 : vector<1x1x8x8xbf16> to vector<8x8xbf16>
    %52 = vector.shape_cast %49 : vector<8x8xbf16> to vector<1x1x8x8xbf16>
    tpu.vector_store %arg6[%c0_43, %c3_44, %c0_45, %c0_46], %52 {strides = array<i32>} : memref<1x4x8x8xbf16, #tpu.memory_space<vmem>>, vector<1x1x8x8xbf16>,
    %53 = vector.extract_strided_slice %8 {offsets = [0, 88], sizes = [8, 8], strides = [1, 1]} : vector<8x96xbf16> to vector<8x8xbf16>
    %c0_47 = arith.constant 0 : index
    %c3_48 = arith.constant 3 : index
    %c0_49 = arith.constant 0 : index
    %c0_50 = arith.constant 0 : index
    %54 = vector.load %arg7[%c0_47, %c3_48, %c0_49, %c0_50] : memref<1x4x8x8xbf16, #tpu.memory_space<vmem>>, vector<1x1x8x8xbf16>
    %55 = vector.shape_cast %54 : vector<1x1x8x8xbf16> to vector<8x8xbf16>
    %56 = vector.shape_cast %53 : vector<8x8xbf16> to vector<1x1x8x8xbf16>
    tpu.vector_store %arg7[%c0_47, %c3_48, %c0_49, %c0_50], %56 {strides = array<i32>} : memref<1x4x8x8xbf16, #tpu.memory_space<vmem>>, vector<1x1x8x8xbf16>,
    return
  }
  func.func @transform_0(%arg0: i32, %arg1: i32) -> (i32, i32, i32) {
    %c0_i32 = arith.constant 0 : i32
    %c0_i32_0 = arith.constant 0 : i32
    return %arg0, %arg1, %c0_i32 : i32, i32, i32
  }
  func.func @transform_1(%arg0: i32, %arg1: i32) -> (i32, i32) {
    %c0_i32 = arith.constant 0 : i32
    %c0_i32_0 = arith.constant 0 : i32
    %c0_i32_1 = arith.constant 0 : i32
    return %c0_i32, %c0_i32_0 : i32, i32
  }
  func.func @transform_2(%arg0: i32, %arg1: i32) -> (i32, i32) {
    %c0_i32 = arith.constant 0 : i32
    %c0_i32_0 = arith.constant 0 : i32
    %c0_i32_1 = arith.constant 0 : i32
    return %c0_i32, %c0_i32_0 : i32, i32
  }
  func.func @transform_3(%arg0: i32, %arg1: i32) -> (i32, i32, i32, i32) {
    %c0_i32 = arith.constant 0 : i32
    %c0_i32_0 = arith.constant 0 : i32
    %c0_i32_1 = arith.constant 0 : i32
    return %arg0, %c0_i32, %arg1, %c0_i32_0 : i32, i32, i32, i32
  }
  func.func @transform_4(%arg0: i32, %arg1: i32) -> (i32, i32, i32, i32) {
    %c0_i32 = arith.constant 0 : i32
    %c0_i32_0 = arith.constant 0 : i32
    %c0_i32_1 = arith.constant 0 : i32
    return %arg0, %c0_i32, %arg1, %c0_i32_0 : i32, i32, i32, i32
  }
  func.func @transform_5(%arg0: i32, %arg1: i32) -> (i32, i32, i32, i32) {
    %c0_i32 = arith.constant 0 : i32
    %c0_i32_0 = arith.constant 0 : i32
    %c0_i32_1 = arith.constant 0 : i32
    return %arg0, %c0_i32, %arg1, %c0_i32_0 : i32, i32, i32, i32
  }
}

module attributes {stable_mosaic.version = 11 : i64} {
  func.func @flash_attn_kernel(%arg0: i32, %arg1: i32, %arg2: i32, %arg3: memref<1x4x8x8xbf16, #tpu.memory_space<vmem>>, %arg4: memref<1x4x8x8xbf16, #tpu.memory_space<vmem>>, %arg5: memref<1x4x8x8xbf16, #tpu.memory_space<vmem>>, %arg6: memref<1x8x8xf32, #tpu.memory_space<vmem>>, %arg7: memref<32x32xbf16, #tpu.memory_space<vmem>>, %arg8: memref<1x32xf32, #tpu.memory_space<vmem>>, %arg9: memref<1x8x32xf32, #tpu.memory_space<vmem>>, %arg10: memref<4x8x1xf32, #tpu.memory_space<vmem>>, %arg11: memref<4x8x1xf32, #tpu.memory_space<vmem>>, %arg12: memref<4x8x8xf32, #tpu.memory_space<vmem>>, %arg13: memref<8x32xf32, #tpu.memory_space<vmem>>) attributes {dimension_semantics = [#tpu.dimension_semantics<parallel>, #tpu.dimension_semantics<parallel>, #tpu.dimension_semantics<arbitrary>], iteration_bounds = array<i64: 2, 1, 1>, scalar_prefetch = 0 : i64, scratch_operands = 4 : i64, tpu.core_type = #tpu.core_type<tc>, window_params = [{transform_indices = @transform_0, window_bounds = array<i64: 1, 4, 8, 8>}, {transform_indices = @transform_1, window_bounds = array<i64: 1, 4, 8, 8>}, {transform_indices = @transform_2, window_bounds = array<i64: 1, 4, 8, 8>}, {transform_indices = @transform_3, window_bounds = array<i64: 1, 8, 8>}, {pipeline_mode = #tpu.pipeline_mode<synchronous>, transform_indices = @transform_4, window_bounds = array<i64: 32, 32>}, {pipeline_mode = #tpu.pipeline_mode<synchronous>, transform_indices = @transform_5, window_bounds = array<i64: 1, 32>}, {transform_indices = @transform_6, window_bounds = array<i64: 1, 8, 32>}]} {
    %c0_i32 = arith.constant 0 : i32
    %0 = arith.cmpi eq, %arg2, %c0_i32 : i32
    %1 = arith.extui %0 : i1 to i32
    %c0_i32_0 = arith.constant 0 : i32
    %2 = arith.cmpi ne, %1, %c0_i32_0 : i32
    scf.if %2 {
      %cst_38 = arith.constant 0xFF800000 : f32
      %41 = vector.broadcast %cst_38 : f32 to vector<4x8x1xf32>
      %c0_39 = arith.constant 0 : index
      %c0_40 = arith.constant 0 : index
      %c0_41 = arith.constant 0 : index
      %42 = vector.load %arg10[%c0_39, %c0_40, %c0_41] : memref<4x8x1xf32, #tpu.memory_space<vmem>>, vector<4x8x1xf32>
      tpu.vector_store %arg10[%c0_39, %c0_40, %c0_41], %41 {strides = array<i32>} : memref<4x8x1xf32, #tpu.memory_space<vmem>>, vector<4x8x1xf32>,
      %cst_42 = arith.constant 0.000000e+00 : f32
      %43 = vector.broadcast %cst_42 : f32 to vector<4x8x1xf32>
      %c0_43 = arith.constant 0 : index
      %c0_44 = arith.constant 0 : index
      %c0_45 = arith.constant 0 : index
      %44 = vector.load %arg11[%c0_43, %c0_44, %c0_45] : memref<4x8x1xf32, #tpu.memory_space<vmem>>, vector<4x8x1xf32>
      tpu.vector_store %arg11[%c0_43, %c0_44, %c0_45], %43 {strides = array<i32>} : memref<4x8x1xf32, #tpu.memory_space<vmem>>, vector<4x8x1xf32>,
      %cst_46 = arith.constant 0.000000e+00 : f32
      %45 = vector.broadcast %cst_46 : f32 to vector<4x8x8xf32>
      %c0_47 = arith.constant 0 : index
      %c0_48 = arith.constant 0 : index
      %c0_49 = arith.constant 0 : index
      %46 = vector.load %arg12[%c0_47, %c0_48, %c0_49] : memref<4x8x8xf32, #tpu.memory_space<vmem>>, vector<4x8x8xf32>
      tpu.vector_store %arg12[%c0_47, %c0_48, %c0_49], %45 {strides = array<i32>} : memref<4x8x8xf32, #tpu.memory_space<vmem>>, vector<4x8x8xf32>,
    } else {
    }
    %c0 = arith.constant 0 : index
    %c0_1 = arith.constant 0 : index
    %c0_2 = arith.constant 0 : index
    %c0_3 = arith.constant 0 : index
    %3 = vector.load %arg3[%c0, %c0_1, %c0_2, %c0_3] : memref<1x4x8x8xbf16, #tpu.memory_space<vmem>>, vector<1x4x8x8xbf16>
    %4 = vector.shape_cast %3 : vector<1x4x8x8xbf16> to vector<4x8x8xbf16>
    %c0_4 = arith.constant 0 : index
    %c0_5 = arith.constant 0 : index
    %c0_6 = arith.constant 0 : index
    %c0_7 = arith.constant 0 : index
    %5 = vector.load %arg4[%c0_4, %c0_5, %c0_6, %c0_7] : memref<1x4x8x8xbf16, #tpu.memory_space<vmem>>, vector<1x4x8x8xbf16>
    %6 = vector.shape_cast %5 : vector<1x4x8x8xbf16> to vector<4x8x8xbf16>
    %c0_8 = arith.constant 0 : index
    %c0_9 = arith.constant 0 : index
    %c0_10 = arith.constant 0 : index
    %c0_11 = arith.constant 0 : index
    %7 = vector.load %arg5[%c0_8, %c0_9, %c0_10, %c0_11] : memref<1x4x8x8xbf16, #tpu.memory_space<vmem>>, vector<1x4x8x8xbf16>
    %8 = vector.shape_cast %7 : vector<1x4x8x8xbf16> to vector<4x8x8xbf16>
    "tpu.trace_start"() <{level = 10 : i32, message = "hqd,hkd->hqk"}> : () -> ()
    %cst = arith.constant dense<0.000000e+00> : vector<4x8x8xf32>
    %9 = tpu.matmul %4, %6, %cst {dimension_numbers = #tpu.dot_dimension_numbers<[2], [2], [1], [1], [0, 0, 0, 1, 1, 1], [0], [0]>} : vector<4x8x8xbf16>, vector<4x8x8xbf16>, vector<4x8x8xf32> -> vector<4x8x8xf32>
    "tpu.trace_stop"() : () -> ()
    %c0_12 = arith.constant 0 : index
    %c0_13 = arith.constant 0 : index
    %c0_14 = arith.constant 0 : index
    %10 = vector.load %arg6[%c0_12, %c0_13, %c0_14] : memref<1x8x8xf32, #tpu.memory_space<vmem>>, vector<1x8x8xf32>
    %11 = vector.shape_cast %10 : vector<1x8x8xf32> to vector<8x8xf32>
    %12 = vector.shape_cast %11 : vector<8x8xf32> to vector<1x8x8xf32>
    %13 = vector.broadcast %12 : vector<1x8x8xf32> to vector<4x8x8xf32>
    %14 = arith.addf %9, %13 : vector<4x8x8xf32>
    %c0_15 = arith.constant 0 : index
    %c0_16 = arith.constant 0 : index
    %c0_17 = arith.constant 0 : index
    %15 = vector.load %arg10[%c0_15, %c0_16, %c0_17] : memref<4x8x1xf32, #tpu.memory_space<vmem>>, vector<4x8x1xf32>
    %cst_18 = arith.constant dense<0xFF800000> : vector<4x8xf32>
    %16 = vector.multi_reduction <maximumf>, %14, %cst_18 [2] : vector<4x8x8xf32> to vector<4x8xf32>
    %17 = vector.shape_cast %16 : vector<4x8xf32> to vector<4x8x1xf32>
    %18 = arith.maximumf %15, %17 : vector<4x8x1xf32>
    %19 = arith.subf %15, %18 : vector<4x8x1xf32>
    %20 = math.exp %19 : vector<4x8x1xf32>
    %21 = vector.broadcast %18 : vector<4x8x1xf32> to vector<4x8x8xf32>
    %22 = arith.subf %14, %21 : vector<4x8x8xf32>
    %23 = math.exp %22 : vector<4x8x8xf32>
    %c0_19 = arith.constant 0 : index
    %c0_20 = arith.constant 0 : index
    %c0_21 = arith.constant 0 : index
    %24 = vector.load %arg11[%c0_19, %c0_20, %c0_21] : memref<4x8x1xf32, #tpu.memory_space<vmem>>, vector<4x8x1xf32>
    %25 = arith.mulf %20, %24 : vector<4x8x1xf32>
    %cst_22 = arith.constant dense<0.000000e+00> : vector<4x8xf32>
    %26 = vector.multi_reduction <add>, %23, %cst_22 [2] : vector<4x8x8xf32> to vector<4x8xf32>
    %27 = vector.shape_cast %26 : vector<4x8xf32> to vector<4x8x1xf32>
    %28 = arith.addf %25, %27 : vector<4x8x1xf32>
    %c0_23 = arith.constant 0 : index
    %c0_24 = arith.constant 0 : index
    %c0_25 = arith.constant 0 : index
    %29 = vector.load %arg11[%c0_23, %c0_24, %c0_25] : memref<4x8x1xf32, #tpu.memory_space<vmem>>, vector<4x8x1xf32>
    tpu.vector_store %arg11[%c0_23, %c0_24, %c0_25], %28 {strides = array<i32>} : memref<4x8x1xf32, #tpu.memory_space<vmem>>, vector<4x8x1xf32>,
    %c0_26 = arith.constant 0 : index
    %c0_27 = arith.constant 0 : index
    %c0_28 = arith.constant 0 : index
    %30 = vector.load %arg12[%c0_26, %c0_27, %c0_28] : memref<4x8x8xf32, #tpu.memory_space<vmem>>, vector<4x8x8xf32>
    %31 = vector.broadcast %20 : vector<4x8x1xf32> to vector<4x8x8xf32>
    %32 = arith.mulf %31, %30 : vector<4x8x8xf32>
    %33 = arith.truncf %23 : vector<4x8x8xf32> to vector<4x8x8xbf16>
    "tpu.trace_start"() <{level = 10 : i32, message = "hqk,hkd->hqd"}> : () -> ()
    %cst_29 = arith.constant dense<0.000000e+00> : vector<4x8x8xf32>
    %34 = tpu.matmul %33, %8, %cst_29 {dimension_numbers = #tpu.dot_dimension_numbers<[2], [1], [1], [2], [0, 0, 0, 1, 1, 2], [0], [0]>} : vector<4x8x8xbf16>, vector<4x8x8xbf16>, vector<4x8x8xf32> -> vector<4x8x8xf32>
    "tpu.trace_stop"() : () -> ()
    %35 = arith.addf %32, %34 : vector<4x8x8xf32>
    %c0_30 = arith.constant 0 : index
    %c0_31 = arith.constant 0 : index
    %c0_32 = arith.constant 0 : index
    %36 = vector.load %arg12[%c0_30, %c0_31, %c0_32] : memref<4x8x8xf32, #tpu.memory_space<vmem>>, vector<4x8x8xf32>
    tpu.vector_store %arg12[%c0_30, %c0_31, %c0_32], %35 {strides = array<i32>} : memref<4x8x8xf32, #tpu.memory_space<vmem>>, vector<4x8x8xf32>,
    %c0_33 = arith.constant 0 : index
    %c0_34 = arith.constant 0 : index
    %c0_35 = arith.constant 0 : index
    %37 = vector.load %arg10[%c0_33, %c0_34, %c0_35] : memref<4x8x1xf32, #tpu.memory_space<vmem>>, vector<4x8x1xf32>
    tpu.vector_store %arg10[%c0_33, %c0_34, %c0_35], %18 {strides = array<i32>} : memref<4x8x1xf32, #tpu.memory_space<vmem>>, vector<4x8x1xf32>,
    %c0_i32_36 = arith.constant 0 : i32
    %38 = arith.cmpi eq, %arg2, %c0_i32_36 : i32
    %39 = arith.extui %38 : i1 to i32
    %c0_i32_37 = arith.constant 0 : i32
    %40 = arith.cmpi ne, %39, %c0_i32_37 : i32
    scf.if %40 {
      %c0_38 = arith.constant 0 : index
      %c0_39 = arith.constant 0 : index
      %c0_40 = arith.constant 0 : index
      %41 = vector.load %arg12[%c0_38, %c0_39, %c0_40] : memref<4x8x8xf32, #tpu.memory_space<vmem>>, vector<4x8x8xf32>
      %c0_41 = arith.constant 0 : index
      %c0_42 = arith.constant 0 : index
      %c0_43 = arith.constant 0 : index
      %42 = vector.load %arg11[%c0_41, %c0_42, %c0_43] : memref<4x8x1xf32, #tpu.memory_space<vmem>>, vector<4x8x1xf32>
      %43 = tpu.reciprocal %42 {approx = true} : vector<4x8x1xf32> -> vector<4x8x1xf32>
      %44 = vector.broadcast %43 : vector<4x8x1xf32> to vector<4x8x8xf32>
      %45 = arith.mulf %41, %44 : vector<4x8x8xf32>
      %46 = vector.extract_strided_slice %45 {offsets = [0, 0, 0], sizes = [1, 8, 8], strides = [1, 1, 1]} : vector<4x8x8xf32> to vector<1x8x8xf32>
      %47 = vector.shape_cast %46 : vector<1x8x8xf32> to vector<8x8xf32>
      %c0_44 = arith.constant 0 : index
      %c0_45 = arith.constant 0 : index
      %48 = vector.load %arg13[%c0_44, %c0_45] : memref<8x32xf32, #tpu.memory_space<vmem>>, vector<8x8xf32>
      tpu.vector_store %arg13[%c0_44, %c0_45], %47 {strides = array<i32>} : memref<8x32xf32, #tpu.memory_space<vmem>>, vector<8x8xf32>,
      %49 = vector.extract_strided_slice %45 {offsets = [1, 0, 0], sizes = [1, 8, 8], strides = [1, 1, 1]} : vector<4x8x8xf32> to vector<1x8x8xf32>
      %50 = vector.shape_cast %49 : vector<1x8x8xf32> to vector<8x8xf32>
      %c0_46 = arith.constant 0 : index
      %c8 = arith.constant 8 : index
      %51 = vector.load %arg13[%c0_46, %c8] : memref<8x32xf32, #tpu.memory_space<vmem>>, vector<8x8xf32>
      tpu.vector_store %arg13[%c0_46, %c8], %50 {strides = array<i32>} : memref<8x32xf32, #tpu.memory_space<vmem>>, vector<8x8xf32>,
      %52 = vector.extract_strided_slice %45 {offsets = [2, 0, 0], sizes = [1, 8, 8], strides = [1, 1, 1]} : vector<4x8x8xf32> to vector<1x8x8xf32>
      %53 = vector.shape_cast %52 : vector<1x8x8xf32> to vector<8x8xf32>
      %c0_47 = arith.constant 0 : index
      %c16 = arith.constant 16 : index
      %54 = vector.load %arg13[%c0_47, %c16] : memref<8x32xf32, #tpu.memory_space<vmem>>, vector<8x8xf32>
      tpu.vector_store %arg13[%c0_47, %c16], %53 {strides = array<i32>} : memref<8x32xf32, #tpu.memory_space<vmem>>, vector<8x8xf32>,
      %55 = vector.extract_strided_slice %45 {offsets = [3, 0, 0], sizes = [1, 8, 8], strides = [1, 1, 1]} : vector<4x8x8xf32> to vector<1x8x8xf32>
      %56 = vector.shape_cast %55 : vector<1x8x8xf32> to vector<8x8xf32>
      %c0_48 = arith.constant 0 : index
      %c24 = arith.constant 24 : index
      %57 = vector.load %arg13[%c0_48, %c24] : memref<8x32xf32, #tpu.memory_space<vmem>>, vector<8x8xf32>
      tpu.vector_store %arg13[%c0_48, %c24], %56 {strides = array<i32>} : memref<8x32xf32, #tpu.memory_space<vmem>>, vector<8x8xf32>,
      %c0_49 = arith.constant 0 : index
      %c0_50 = arith.constant 0 : index
      %58 = vector.load %arg13[%c0_49, %c0_50] : memref<8x32xf32, #tpu.memory_space<vmem>>, vector<8x32xf32>
      %59 = arith.truncf %58 : vector<8x32xf32> to vector<8x32xbf16>
      %c0_51 = arith.constant 0 : index
      %c0_52 = arith.constant 0 : index
      %60 = vector.load %arg7[%c0_51, %c0_52] : memref<32x32xbf16, #tpu.memory_space<vmem>>, vector<32x32xbf16>
      %cst_53 = arith.constant dense<0.000000e+00> : vector<8x32xf32>
      %61 = tpu.matmul %59, %60, %cst_53 {dimension_numbers = #tpu.dot_dimension_numbers<[1], [0], [0], [1], [0, 0, 1, 1], [], []>} : vector<8x32xbf16>, vector<32x32xbf16>, vector<8x32xf32> -> vector<8x32xf32>
      %c0_54 = arith.constant 0 : index
      %c0_55 = arith.constant 0 : index
      %62 = vector.load %arg8[%c0_54, %c0_55] : memref<1x32xf32, #tpu.memory_space<vmem>>, vector<1x32xf32>
      %63 = vector.broadcast %62 : vector<1x32xf32> to vector<8x32xf32>
      %64 = arith.addf %61, %63 : vector<8x32xf32>
      %c0_56 = arith.constant 0 : index
      %c0_57 = arith.constant 0 : index
      %c0_58 = arith.constant 0 : index
      %65 = vector.load %arg9[%c0_56, %c0_57, %c0_58] : memref<1x8x32xf32, #tpu.memory_space<vmem>>, vector<1x8x32xf32>
      %66 = vector.shape_cast %65 : vector<1x8x32xf32> to vector<8x32xf32>
      %67 = vector.shape_cast %64 : vector<8x32xf32> to vector<1x8x32xf32>
      tpu.vector_store %arg9[%c0_56, %c0_57, %c0_58], %67 {strides = array<i32>} : memref<1x8x32xf32, #tpu.memory_space<vmem>>, vector<1x8x32xf32>,
    } else {
    }
    return
  }
  func.func @transform_0(%arg0: i32, %arg1: i32, %arg2: i32) -> (i32, i32, i32, i32) {
    %c0_i32 = arith.constant 0 : i32
    %c0_i32_0 = arith.constant 0 : i32
    %c0_i32_1 = arith.constant 0 : i32
    return %arg0, %c0_i32, %arg1, %c0_i32_0 : i32, i32, i32, i32
  }
  func.func @transform_1(%arg0: i32, %arg1: i32, %arg2: i32) -> (i32, i32, i32, i32) {
    %c0_i32 = arith.constant 0 : i32
    %c0_i32_0 = arith.constant 0 : i32
    %c0_i32_1 = arith.constant 0 : i32
    return %arg0, %c0_i32, %arg2, %c0_i32_0 : i32, i32, i32, i32
  }
  func.func @transform_2(%arg0: i32, %arg1: i32, %arg2: i32) -> (i32, i32, i32, i32) {
    %c0_i32 = arith.constant 0 : i32
    %c0_i32_0 = arith.constant 0 : i32
    %c0_i32_1 = arith.constant 0 : i32
    return %arg0, %c0_i32, %arg2, %c0_i32_0 : i32, i32, i32, i32
  }
  func.func @transform_3(%arg0: i32, %arg1: i32, %arg2: i32) -> (i32, i32, i32) {
    %c0_i32 = arith.constant 0 : i32
    return %arg0, %arg1, %arg2 : i32, i32, i32
  }
  func.func @transform_4(%arg0: i32, %arg1: i32, %arg2: i32) -> (i32, i32) {
    %c0_i32 = arith.constant 0 : i32
    %c0_i32_0 = arith.constant 0 : i32
    %c0_i32_1 = arith.constant 0 : i32
    return %c0_i32, %c0_i32_0 : i32, i32
  }
  func.func @transform_5(%arg0: i32, %arg1: i32, %arg2: i32) -> (i32, i32) {
    %c0_i32 = arith.constant 0 : i32
    %c0_i32_0 = arith.constant 0 : i32
    %c0_i32_1 = arith.constant 0 : i32
    return %c0_i32, %c0_i32_0 : i32, i32
  }
  func.func @transform_6(%arg0: i32, %arg1: i32, %arg2: i32) -> (i32, i32, i32) {
    %c0_i32 = arith.constant 0 : i32
    %c0_i32_0 = arith.constant 0 : i32
    return %arg0, %arg1, %c0_i32 : i32, i32, i32
  }
}

</mosaic_0001>

<bundles_post_ra>
// kernel: decoder_attention.3
= control target key start
LH: loop header
LB: loop body
LE: loop exit
PB: predicated region body
PF: predicated region fallthrough
CT: control target
= control target key end

     0   :  { %s1598_s0 = inlined_call_operand.vmem [shape: bf16[2,4,8,8], index: 0, kind: input, shape index: {}]   ;;  %s1599_s1 = inlined_call_operand.vmem [shape: bf16[2,4,8,8], index: 1, kind: input, shape index: {}]   ;;  %s1600_s2 = inlined_call_operand.vmem [shape: bf16[2,4,8,8], index: 2, kind: input, shape index: {}]   ;;  %s1601_s3 = inlined_call_operand.hbm [shape: f32[2,8,8], index: 3, kind: input, shape index: {}]   ;;  %s1602_s4 = inlined_call_operand.hbm [shape: bf16[32,32], index: 4, kind: input, shape index: {}]   ;;  %s1603_s5 = inlined_call_operand.vmem [shape: f32[1,32], index: 5, kind: input, shape index: {}]   ;;  %s1604_s6 = inlined_call_operand.hbm [shape: f32[2,8,32], index: 6, kind: output, shape index: {}]  }
   0x1   :  { %1605 = sst [smem:[#allocation15_spill]] %s1602_s4 }
   0x2   :  { %11 = vsyncpa [#allocation7], 0 }
   0x3   :  { %13 = vsyncpa [#allocation7 + $0x1], 0 }
   0x4   :  { %14 = vsyncpa [#allocation10], 0 }
   0x5   :  { %15 = vsyncpa [#allocation8], 0 }
   0x6   :  { %17 = vsyncpa [#allocation8 + $0x1], 0  ;;  %s1336_s21 = smov 0   ;;  %s1338_s22 = smov 0  }
   0x7   :  { %s1340_s23 = smov 0   ;;  %s1342_s24 = smov 0  }
   0x8   :  { %s1344_s25 = smov 0   ;;  %s1346_s26 = smov 0  }
   0x9 LB: > { %s992_s27 = sadd.s32 4294967295, %s1290_s26   ;;  %p994_p0 = scmp.ge.s32.totalorder %s1290_s26, 1  ;;  %s1290_s26 = sphi %s1346_s26, %s23_s26   ;;  %s1286_s25 = sphi %s1344_s25, %s1617_s25   ;;  %s1282_s24 = sphi %s1342_s24, %s1616_s24   ;;  %s1278_s23 = sphi %s1340_s23, %s1615_s23   ;;  %s1274_s22 = sphi %s1338_s22, %s1614_s22   ;;  %s1270_s21 = sphi %s1336_s21, %s1613_s21  }
   0xa   : > { %p1368_p1 = scmp.eq.s32.totalorder %s992_s27, 0  ;;  %p231_p2 = scmp.lt.s32.totalorder %s1290_s26, 3 }
   0xb   : > { %s1607_s4 = sld [smem:[#allocation15_spill]]  ;;  %s1292_s9 = smov [#allocation9]  }
   0xc   : > { %p1376_p3 = pnand %p994_p0, %p231_p2  ;;  %s244_s10 = sshll.u32 %s1292_s9, 4  ;;  %s245_s10 = int_to_ptr.vmem [resolvable:$true] %s244_s10 }
   0xd   : > { %p996_p6 = scmp.ge.s32.totalorder %s1290_s26, 2  ;;  %s1293_s11 = smov 64  }
   0xe   : > { %p1043_p4 = pneg %p1376_p3  ;;  %s1294_s12 = smov 4  }
   0xf   : > { %s993_s13 = sadd.s32 4294967294, %s1290_s26   ;;  %s42_s14 = sadd.s32 1, %s1286_s25 }
  0x10   : > { %p1044_p5 = pnand %p1043_p4, %p1368_p1  ;;  %s137_s15 = sadd.s32 1, %s1278_s23 }
  0x11   : > { %s242_s7 = sshll.u32 %s1607_s4, 4  ;;  %p44_p7 = scmp.ge.s32.totalorder %s42_s14, 2  ;;  %s243_s7 = int_to_ptr.hbm [resolvable:$true] %s242_s7 }
  0x12   : > { %1046 = dma.hbm_to_vmem [thread:$0]  (!%p1044_p5), %s243_s7, 256, %s245_s10, [#allocation10], %s1293_s11, %s1293_s11, %s1294_s12  }
  0x13   : > { %p144_p8 = scmp.ne.s32.totalorder %s1278_s23, %s1274_s22  ;;  %p145_p9 = scmp.eq.s32.totalorder %s1290_s26, 0 }
  0x14   : > { %p150_p10 = scmp.ne.s32.totalorder %s1274_s22, %s1270_s21  ;;  %s1619_s14 = smov (%p44_p7, %s42_s14), 0 }
  0x15   : > { %p1395_p11 = por %p145_p9, %p144_p8  ;;  %s130_s18 = ssub.s32 %s1286_s25, %s1619_s14 }
  0x16   : > { %p1401_p12 = por %p1368_p1, %p150_p10  ;;  %p218_p13 = scmp.eq.s32.totalorder %s992_s27, 1 }
  0x17   : > { %p135_p0 = scmp.eq.s32.totalorder %s130_s18, 0  ;;  %p224_p2 = scmp.eq.s32.totalorder %s993_s13, 1 }
  0x18   : > { %p1407_p4 = por %p218_p13, %p144_p8  ;;  %p1056_p5 = scmp.lt.s32.totalorder %s1290_s26, 2 }
  0x19   : > { %s1413_s20 = scalar_select %p135_p0, %s1278_s23, %s137_s15  }
  0x1a   : > { %p1415_p7 = por %p224_p2, %p150_p10  ;;  %s294_s30 = sand.u32 1, %s1278_s23  }
  0x1b   : > { %s997_s7 = sshll.u32 %s294_s30, 3  ;;  %s998_s9 = sshll.u32 %s1286_s25, 3 }
  0x1c   : > { %s304_s27 = scalar_lea.hbm %s1601_s3, %s998_s9  ;;  %s298_s12 = scalar_lea.vmem [#allocation6], %s997_s7 }
  0x1d   : > { %s308_s13 = sshll.u32 %s298_s12, 4  ;;  %s306_s18 = sshll.u32 %s304_s27, 4  ;;  %s309_s13 = int_to_ptr.vmem [resolvable:$true] %s308_s13  ;;  %s307_s18 = int_to_ptr.hbm [resolvable:$true] %s306_s18 }
  0x1e   : > { %p1048_p8 = pnand %p1056_p5, %p1395_p11  ;;  %s295_s15 = scalar_lea.sflag [#allocation7], %s294_s30 }
  0x1f   : > { %317 = sbr.rel (%p1376_p3) target bundleno = 944 (0x3b0), region = 44  ;;  %s1429_s4 = sand.u32 (!%p1376_p3), 1, %s1274_s22  }
  0x20   : > { %1050 = dma.hbm_to_vmem [thread:$0]  (!%p1048_p8), %s307_s18, 128, %s309_s13, %s295_s15  }
  0x21   : > { %s1000_s9 = sshll.u32 (!%p1376_p3), %s1429_s4, 3  ;;  %s320_s7 = scalar_lea.sflag (!%p1376_p3), [#allocation7], %s1429_s4 }
  0x22   : > { %s1435_s10 = scalar_lea.vmem (!%p1376_p3), [#allocation6], %s1000_s9 }
  0x24   : > { %1257 = dma.done.wait (%p1401_p12), %s320_s7, 128  }
  0x25   : > { %1259 = vsyncadd (%p1401_p12), %s320_s7, 4294967168 }
  0x26   : > { %1261 = dma.done.wait (%p1368_p1), [#allocation10], 256  }
  0x27   : > { %1263 = vsyncadd (%p1368_p1), [#allocation10], 4294967040  ;;  %p382_p3 = scmp.lt.s32.totalorder %s1282_s24, 1  ;;  %vm420_vm0 = vcmask 64512   ;;  %vm411_vm1 = vcmask 7168   ;;  %v1295_v12 = vmov -inf  }
  0x28   : > { %413 = vst.msk [vmem:[#allocation2 + $0x8] sm:$0xff] %vm411_vm1, %v1295_v12  ;;  %v437_v13 = vld [vmem:[%s1435_s10] sm:$0xff]  ;;  %v1296_v30 = vmov 0   ;;  %v1297_v31 = vmov 0.0   ;;  %vm643_vm2 = vcmask 1043456   ;;  %s1298_s7 = smov 8  }
  0x29   : > { %s383_s8 = scalar_select %p382_p3, %s1282_s24, 1  ;;  %412 = vst.msk [vmem:[#allocation2] sm:$0xff] %vm411_vm1, %v1295_v12  ;;  %1118 = vset.pattern.permute.xlu0 %v1296_v30  ;;  %1116 = vset.pattern.permute.xlu1 %v1296_v30  ;;  %vm773_vm3 = vcmask 130112   ;;  %vm779_vm4 = vcmask 195712   ;;  %vm785_vm5 = vcmask 261312   ;;  %vm809_vm6 = vcmask 261120  }
  0x2a   : > { %414 = vst.msk [vmem:[#allocation2 + $0x10] sm:$0xff] %vm411_vm1, %v1295_v12  ;;  %1117 = vset.pattern.permute.xlu2 %v1296_v30  ;;  %s1299_s10 = smov 24  }
  0x2b   : > { %s1447_s16 = sshll.u32 %s383_s8, 4  ;;  %415 = vst.msk [vmem:[#allocation2 + $0x18] sm:$0xff] %vm411_vm1, %v1295_v12  ;;  %s1300_s8 = smov 16  }
  0x2c   : > { %s397_s27 = scalar_lea.vmem %s1599_s1, %s1447_s16  ;;  %s389_s12 = scalar_lea.vmem %s1598_s0, %s1447_s16  ;;  %419 = vst.msk [vmem:[#allocation3 + $0x18] sm:$0xff] %vm411_vm1, %v1297_v31 }
  0x2d   : > { %v430_v0 = vld [vmem:[%s397_s27 + $0x4] sm:$0xf]  ;;  %v431_v1 = vld [vmem:[%s397_s27 + $0x8] sm:$0xf]  ;;  %v432_v4 = vld [vmem:[%s397_s27 + $0xc] sm:$0xf]  ;;  %s405_s15 = scalar_lea.vmem %s1600_s2, %s1447_s16 }
  0x2e   : > { %v462_v2 = vsel %vm420_vm0, %v430_v0, 0  ;;  %v481_v3 = vsel %vm420_vm0, %v431_v1, 0  ;;  %v500_v5 = vsel %vm420_vm0, %v432_v4, 0  ;;  %v429_v6 = vld [vmem:[%s397_s27] sm:$0xf]  ;;  %416 = vst.msk [vmem:[#allocation3] sm:$0xff] %vm411_vm1, %v1297_v31 }
  0x2f   : > { %471 = vmatpush.bf16.xpose.msra.mxu1 %v462_v2  ;;  %490 = vmatpush.bf16.xpose.msra.mxu2 %v481_v3  ;;  %v443_v7 = vsel %vm420_vm0, %v429_v6, 0  ;;  %v426_v8 = vld [vmem:[%s389_s12 + $0x4] sm:$0xf]  ;;  %v427_v9 = vld [vmem:[%s389_s12 + $0x8] sm:$0xf]  ;;  %417 = vst.msk [vmem:[#allocation3 + $0x8] sm:$0xff] %vm411_vm1, %v1297_v31 }
  0x30   : > { %509 = vmatpush.bf16.xpose.msra.mxu3 %v500_v5  ;;  %452 = vmatpush.bf16.xpose.msra.mxu0 %v443_v7  ;;  %v428_v10 = vld [vmem:[%s389_s12 + $0xc] sm:$0xf]  ;;  %v425_v11 = vld [vmem:[%s389_s12] sm:$0xf]  ;;  %418 = vst.msk [vmem:[#allocation3 + $0x10] sm:$0xff] %vm411_vm1, %v1297_v31  ;;  %s1027_s16 = sshll.u32 %s1282_s24, 3 }
  0x31   : > { %421 = vst.msk [vmem:[#allocation4] sm:$0xff] %vm420_vm0, %v1297_v31  ;;  %v1491_v32 = vld [vmem:[#allocation2 + $0x8] sm:$0xff]  ;;  %v1493_v34 = vld [vmem:[#allocation2] sm:$0xff]  ;;  %v1506_v39 = vld [vmem:[#allocation2 + $0x10] sm:$0xff]  ;;  %s839_s27 = scalar_lea.hbm %s1604_s6, %s1027_s16  ;;  %s381_s12 = scalar_lea.vmem [#allocation11], %s1000_s9 }
  0x32   : > { %422 = vst.msk [vmem:[#allocation4 + $0x8] sm:$0xff] %vm420_vm0, %v1297_v31  ;;  %v518_v44 = vld [vmem:[#allocation2 + $0x18] sm:$0xff]  ;;  %v436_v48 = vld [vmem:[%s405_s15 + $0xc] sm:$0xf]  ;;  %v433_v50 = vld [vmem:[%s405_s15] sm:$0xf] }
  0x33   : > { %423 = vst.msk [vmem:[#allocation4 + $0x10] sm:$0xff] %vm420_vm0, %v1297_v31  ;;  %v702_v49 = vsel %vm643_vm2, %v436_v48, 0  ;;  %v645_v51 = vsel %vm643_vm2, %v433_v50, 0  ;;  %v434_v52 = vld [vmem:[%s405_s15 + $0x4] sm:$0xf]  ;;  %s841_s13 = sshll.u32 %s381_s12, 4  ;;  %s842_s13 = int_to_ptr.vmem [resolvable:$true] %s841_s13 }
  0x34   : > { %424 = vst.msk [vmem:[#allocation4 + $0x18] sm:$0xff] %vm420_vm0, %v1297_v31  ;;  %v664_v53 = vsel %vm643_vm2, %v434_v52, 0  ;;  %v435_v54 = vld [vmem:[%s405_s15 + $0x8] sm:$0xf]  ;;  %s843_s18 = sshll.u32 %s839_s27, 4  ;;  %s828_s15 = scalar_lea.sflag [#allocation8], %s1429_s4  ;;  %s844_s18 = int_to_ptr.hbm [resolvable:$true] %s843_s18 }
  0x35   : > { %v683_v55 = vsel %vm643_vm2, %v435_v54, 0  ;;  %s1218_s24 = sshra.s32 %s844_s18, 4  ;;  %s1224_s16 = scalar_lea.hbm %s1604_s6, 16  ;;  %s1219_s24 = int_to_ptr.hbm [resolvable:$true] %s1218_s24 }
  0x36   : > { %1010 = vmatmul.msk.bf16.vlgmr.msra.gmra.mxu1 %vm420_vm0, %v426_v8  ;;  %1011 = vmatmul.msk.bf16.vlgmr.msra.gmra.mxu2 %vm420_vm0, %v427_v9  ;;  %p1225_p11 = scmp.lt.s32.totalorder %s1219_s24, %s1604_s6 }
  0x37   : > { %1012 = vmatmul.msk.bf16.vlgmr.msra.gmra.mxu3 %vm420_vm0, %v428_v10  ;;  %1009 = vmatmul.msk.bf16.vlgmr.msra.gmra.mxu0 %vm420_vm0, %v425_v11  ;;  %v581_v31 = vld [vmem:[#allocation3 + $0x10] sm:$0xff] }
  0x38   : > { %711 = vmatpush.bf16.msrb.mxu3 %v702_v49  ;;  %654 = vmatpush.bf16.msrb.mxu0 %v645_v51 }
  0x39   : > { %673 = vmatpush.bf16.msrb.mxu1 %v664_v53  ;;  %692 = vmatpush.bf16.msrb.mxu2 %v683_v55  ;;  %v609_v48 = vld [vmem:[#allocation4 + $0x8] sm:$0xff] }
  0xb3   : > { %v473_v14 = vpop.f32.mrf.mxu1 }
  0xb4   : > { %v1470_v15 = vadd.f32 %v473_v14, %v437_v13  ;;  %v454_v16 = vpop.f32.mrf.mxu0 }
  0xb5   : > { %v1474_v18 = vadd.f32 %v454_v16, %v437_v13 }
  0xb6   : > { %v522_v17 = vsel %vm420_vm0, %v1470_v15, -inf }
  0xb7   : > { %523 = vmax.xlane.f32.xlu1 %v522_v17  ;;  %v519_v19 = vsel %vm420_vm0, %v1474_v18, -inf }
  0xb8   : > { %520 = vmax.xlane.f32.xlu2 %v519_v19 }
  0xb9   : > { %v492_v20 = vpop.f32.mrf.mxu2 }
  0xba   : > { %v1478_v21 = vadd.f32 %v492_v20, %v437_v13  ;;  %v511_v22 = vpop.f32.mrf.mxu3 }
  0xbb   : > { %v475_v23 = vpop.f32.mrf.mxu1  ;;  %v512_v26 = vadd.f32 %v511_v22, %v437_v13  ;;  %v582_v22 = vld [vmem:[#allocation3 + $0x18] sm:$0xff] }
  0xbc   : > { %v525_v24 = vsel %vm420_vm0, %v1478_v21, -inf  ;;  %v456_v25 = vpop.f32.mrf.mxu0 }
  0xbd   : > { %526 = vmax.xlane.f32.xlu0 %v525_v24  ;;  %v528_v28 = vsel %vm420_vm0, %v512_v26, -inf }
  0xc1   : > { %v494_v27 = vpop.f32.mrf.mxu2 }
  0xc2   : > { %v513_v29 = vpop.f32.mrf.mxu3  ;;  %v580_v27 = vld [vmem:[#allocation3 + $0x8] sm:$0xff] }
  0xc5   : > { %529 = vmax.xlane.f32.xlu0 %v528_v28 }
 0x12a   : > { %v524_v33 = vpop.xlane.xlu1 %523 }
 0x12b   : > { %v1496_v35 = vmax.f32 %v1491_v32, %v524_v33  ;;  %v521_v36 = vpop.xlane.xlu2 %520  ;;  %v579_v33 = vld [vmem:[#allocation3] sm:$0xff] }
 0x12c   : > { %v1504_v38 = vmax.f32 %v1493_v34, %v521_v36 }
 0x12d   : > { %v536_v37 = vsub.f32 %v1491_v32, %v1496_v35  ;;  %726 = vst.msk [vmem:[#allocation2 + $0x8] sm:$0xff] %vm411_vm1, %v1496_v35  ;;  %554 = vperm.xlu0 %1118, %v1496_v35  }
 0x12e   : > { %v535_v40 = vsub.f32 %v1493_v34, %v1504_v38  ;;  %725 = vst.msk [vmem:[#allocation2] sm:$0xff] %vm411_vm1, %v1504_v38 }
 0x130   : > { %v527_v41 = vpop.xlane.xlu0 %526 }
 0x131   : > { %v1513_v42 = vmax.f32 %v1506_v39, %v527_v41 }
 0x133   : > { %v537_v43 = vsub.f32 %v1506_v39, %v1513_v42  ;;  %727 = vst.msk [vmem:[#allocation2 + $0x10] sm:$0xff] %vm411_vm1, %v1513_v42  ;;  %559 = vperm.xlu1 %1116, %v1513_v42   ;;  %v611_v42 = vld [vmem:[#allocation4 + $0x18] sm:$0xff] }
 0x135   : > { %v543_v19 = vmul.f32 1.442695, %v537_v43 }
 0x138   : > { %v530_v45 = vpop.xlane.xlu0 %529 }
 0x139   : > { %v534_v46 = vmax.f32 %v518_v44, %v530_v45 }
 0x13b   : > { %v538_v47 = vsub.f32 %v518_v44, %v534_v46  ;;  %728 = vst.msk [vmem:[#allocation2 + $0x18] sm:$0xff] %vm411_vm1, %v534_v46  ;;  %564 = vperm.xlu2 %1117, %v534_v46  }
 0x13d   : > { %v545_v10 = vmul.f32 1.442695, %v538_v47 }
 0x143   : > { %549 = vperm.xlu2 %1117, %v1504_v38  }
 0x195   : > { %v565_v56 = vpop.permute.xlu2 %564 }
 0x196   : > { %v570_v57 = vsub.f32 %v512_v26, %v565_v56  ;;  %v539_v26 = vmul.f32 1.442695, %v535_v40 }
 0x198   : > { %v577_v58 = vmul.f32 1.442695, %v570_v57 }
 0x19a   : > { %1120 = vpow2.f32 %v577_v58 }
 0x19d   : > { %v550_v59 = vpop.permute.xlu2 %549 }
 0x19e   : > { %v567_v60 = vsub.f32 %v1474_v18, %v550_v59  ;;  %v541_v18 = vmul.f32 1.442695, %v536_v37 }
 0x19f   : > { %v555_v61 = vpop.permute.xlu0 %554 }
 0x1a0   : > { %v1121_v62 = vpop.eup %1120  ;;  %v571_v63 = vmul.f32 1.442695, %v567_v60  ;;  %v568_v0 = vsub.f32 %v1470_v15, %v555_v61 }
 0x1a1   : > { %v596_v1 = vsel %vm420_vm0, %v1121_v62, 0.0  ;;  %v639_v2 = vpack.c.bf16 %v1121_v62, %v1121_v62 }
 0x1a2   : > { %1122 = vpow2.f32 %v571_v63  ;;  %v573_v3 = vmul.f32 1.442695, %v568_v0  ;;  %597 = vadd.xlane.f32.xlu0 %v596_v1  ;;  %v610_v63 = vld [vmem:[#allocation4 + $0x10] sm:$0xff] }
 0x1a3   : > { %1016 = vmatmul.msk.bf16.vlgmr.msrb.gmra.mxu3 %vm420_vm0, %v639_v2 }
 0x1a4   : > { %1124 = vpow2.f32 %v573_v3 }
 0x1a5   : > { %v560_v4 = vpop.permute.xlu1 %559 }
 0x1a6   : > { %v569_v5 = vsub.f32 %v1478_v21, %v560_v4 }
 0x1a8   : > { %v1123_v6 = vpop.eup %1122  ;;  %v575_v7 = vmul.f32 1.442695, %v569_v5 }
 0x1a9   : > { %v636_v8 = vpack.c.bf16 %v1123_v6, %v1123_v6  ;;  %v587_v16 = vsel %vm420_vm0, %v1123_v6, 0.0 }
 0x1aa   : > { %v1125_v9 = vpop.eup %1124  ;;  %1126 = vpow2.f32 %v575_v7 }
 0x1ab   : > { %1013 = vmatmul.msk.bf16.vlgmr.msrb.gmra.mxu0 %vm420_vm0, %v636_v8  ;;  %v590_v11 = vsel %vm420_vm0, %v1125_v9, 0.0  ;;  %v637_v12 = vpack.c.bf16 %v1125_v9, %v1125_v9  ;;  %1128 = vpow2.f32 %v545_v10 }
 0x1ac   : > { %591 = vadd.xlane.f32.xlu1 %v590_v11  ;;  %1130 = vpow2.f32 %v541_v18 }
 0x1ad   : > { %1014 = vmatmul.msk.bf16.vlgmr.msrb.gmra.mxu1 %vm420_vm0, %v637_v12  ;;  %1132 = vpow2.f32 %v543_v19 }
 0x1ae   : > { %1134 = vpow2.f32 %v539_v26 }
 0x1b0   : > { %v1127_v13 = vpop.eup %1126 }
 0x1b1   : > { %v593_v14 = vsel %vm420_vm0, %v1127_v13, 0.0  ;;  %v638_v15 = vpack.c.bf16 %v1127_v13, %v1127_v13  ;;  %v1129_v17 = vpop.eup %1128  ;;  %v608_v13 = vld [vmem:[#allocation4] sm:$0xff] }
 0x1b2   : > { %594 = vadd.xlane.f32.xlu2 %v593_v14  ;;  %v1131_v20 = vpop.eup %1130  ;;  %v586_v23 = vmul.f32 %v1129_v17, %v582_v22  ;;  %v1033_v22 = vld [vmem:[#allocation9] sm:$0xff] }
 0x1b3   : > { %1015 = vmatmul.msk.bf16.vlgmr.msrb.gmra.mxu2 %vm420_vm0, %v638_v15  ;;  %v1133_v21 = vpop.eup %1132  ;;  %v584_v28 = vmul.f32 %v1131_v20, %v580_v27  ;;  %v1119_v27 = vld [vmem:[%s1603_s5] ss:$0 sm:$0xff] }
 0x1b4   : > { %588 = vadd.xlane.f32.xlu1 %v587_v16  ;;  %v1135_v32 = vpop.eup %1134  ;;  %v585_v35 = vmul.f32 %v1133_v21, %v581_v31 }
 0x1b5   : > { %v583_v41 = vmul.f32 %v1135_v32, %v579_v33 }
 0x1b6   : > { %629 = vperm.xlu0 %1118, %v1129_v17  }
 0x1ca   : > { %619 = vperm.xlu2 %1117, %v1131_v20  }
 0x1cd   : > { %624 = vperm.xlu1 %1116, %v1133_v21   ;;  %v1034_v21 = vld [vmem:[#allocation9 + $0x8] sm:$0xff] }
 0x1ce   : > { %819 = vmatpush.bf16.msra.mxu0 %v1034_v21 }
 0x1d2   : > { %820 = vmatpush.bf16.msra.mxu0 %v1033_v22 }
 0x215   : > { %v598_v24 = vpop.xlane.xlu0 %597 }
 0x216   : > { %v602_v25 = vadd.f32 %v598_v24, %v586_v23 }
 0x218   : > { %607 = vst.msk [vmem:[#allocation3 + $0x18] sm:$0xff] %vm411_vm1, %v602_v25 }
 0x21f   : > { %v592_v29 = vpop.xlane.xlu1 %591  ;;  %v739_v52 = vld [vmem:[#allocation3 + $0x18] sm:$0xff] }
 0x220   : > { %v600_v30 = vadd.f32 %v592_v29, %v584_v28 }
 0x222   : > { %605 = vst.msk [vmem:[#allocation3 + $0x8] sm:$0xff] %vm411_vm1, %v600_v30 }
 0x225   : > { %v595_v36 = vpop.xlane.xlu2 %594 }
 0x226   : > { %v601_v37 = vadd.f32 %v595_v36, %v585_v35  ;;  %v713_v39 = vpop.f32.mrf.mxu3 }
 0x227   : > { %v589_v43 = vpop.xlane.xlu1 %588 }
 0x228   : > { %606 = vst.msk [vmem:[#allocation3 + $0x10] sm:$0xff] %vm411_vm1, %v601_v37  ;;  %v599_v34 = vadd.f32 %v589_v43, %v583_v41  ;;  %v630_v38 = vpop.permute.xlu0 %629  ;;  %v656_v40 = vpop.f32.mrf.mxu0 }
 0x229   : > { %v635_v44 = vmul.f32 %v630_v38, %v611_v42  ;;  %v737_v45 = vld [vmem:[#allocation3 + $0x8] sm:$0xff] }
 0x22a   : > { %604 = vst.msk [vmem:[#allocation3] sm:$0xff] %vm411_vm1, %v599_v34  ;;  %v675_v46 = vpop.f32.mrf.mxu1  ;;  %1136 = vrcp.f32 %v737_v45 }
 0x22b   : > { %v720_v47 = vadd.f32 %v713_v39, %v635_v44 }
 0x22d   : > { %724 = vst.msk [vmem:[#allocation4 + $0x18] sm:$0xff] %vm420_vm0, %v720_v47  ;;  %v620_v49 = vpop.permute.xlu2 %619 }
 0x22e   : > { %v633_v50 = vmul.f32 %v620_v49, %v609_v48  ;;  %v715_v51 = vpop.f32.mrf.mxu3 }
 0x22f   : > { %v738_v53 = vld [vmem:[#allocation3 + $0x10] sm:$0xff] }
 0x230   : > { %v1137_v54 = vpop.eup %1136  ;;  %v718_v55 = vadd.f32 %v675_v46, %v633_v50  ;;  %v658_v56 = vpop.f32.mrf.mxu0  ;;  %1138 = vrcp.f32 %v738_v53 }
 0x231   : > { %751 = vperm.xlu2 %1117, %v1137_v54   ;;  %1140 = vrcp.f32 %v739_v52  ;;  %v736_v57 = vld [vmem:[#allocation3] sm:$0xff] }
 0x232   : > { %722 = vst.msk [vmem:[#allocation4 + $0x8] sm:$0xff] %vm420_vm0, %v718_v55  ;;  %v677_v58 = vpop.f32.mrf.mxu1  ;;  %1142 = vrcp.f32 %v736_v57 }
 0x234   : > { %v735_v7 = vld [vmem:[#allocation4 + $0x18] sm:$0xff] }
 0x236   : > { %v1139_v59 = vpop.eup %1138  ;;  %v694_v60 = vpop.f32.mrf.mxu2 }
 0x237   : > { %v1141_v61 = vpop.eup %1140  ;;  %756 = vperm.xlu1 %1116, %v1139_v59  }
 0x238   : > { %v1143_v62 = vpop.eup %1142 }
 0x239   : > { %761 = vperm.xlu2 %1117, %v1141_v61   ;;  %746 = vperm.xlu0 %1118, %v1143_v62   ;;  %v733_v4 = vld [vmem:[#allocation4 + $0x8] sm:$0xff] }
 0x23e   : > { %v696_v0 = vpop.f32.mrf.mxu2 }
 0x23f   : > { %v625_v1 = vpop.permute.xlu1 %624  ;;  %614 = vperm.xlu1 %1116, %v1135_v32  }
 0x240   : > { %v634_v2 = vmul.f32 %v625_v1, %v610_v63 }
 0x242   : > { %v719_v3 = vadd.f32 %v694_v60, %v634_v2 }
 0x244   : > { %723 = vst.msk [vmem:[#allocation4 + $0x10] sm:$0xff] %vm420_vm0, %v719_v3 }
 0x24b   : > { %v734_v10 = vld [vmem:[#allocation4 + $0x10] sm:$0xff] }
 0x28b   : > { %v752_v5 = vpop.permute.xlu2 %751 }
 0x28c   : > { %v765_v6 = vmul.f32 %v752_v5, %v733_v4 }
 0x28e   : > { %770 = vrot.lane.b32.xlu2 %v765_v6, %s1298_s7  ;;  %s1220_s7 = scalar_lea.hbm %s1219_s24, 8 }
 0x28f   : > { %p1221_p1 = scmp.ne.s32.totalorder %s1219_s24, %s1220_s7  ;;  %p1226_p12 = scmp.lt.s32.totalorder %s1224_s16, %s1220_s7 }
 0x291   : > { %p1222_p9 = pnand %p1221_p1, %p1407_p4  ;;  %p1227_p13 = por %p1226_p12, %p1225_p11 }
 0x293   : > { %v762_v8 = vpop.permute.xlu2 %761  ;;  %p1223_p10 = pneg %p1222_p9 }
 0x294   : > { %v767_v9 = vmul.f32 %v762_v8, %v735_v7 }
 0x295   : > { %p1228_p0 = pnand %p1227_p13, %p1223_p10 }
 0x296   : > { %782 = vrot.lane.b32.xlu0 %v767_v9, %s1299_s10 }
 0x2a9   : > { %v757_v11 = vpop.permute.xlu1 %756 }
 0x2aa   : > { %v766_v12 = vmul.f32 %v757_v11, %v734_v10 }
 0x2ab   : > { %v747_v17 = vpop.permute.xlu0 %746 }
 0x2ac   : > { %776 = vrot.lane.b32.xlu1 %v766_v12, %s1300_s8 }
 0x2b1   : > { %v615_v14 = vpop.permute.xlu1 %614 }
 0x2b2   : > { %v632_v15 = vmul.f32 %v615_v14, %v608_v13 }
 0x2b4   : > { %v717_v16 = vadd.f32 %v656_v40, %v632_v15 }
 0x2b6   : > { %721 = vst.msk [vmem:[#allocation4] sm:$0xff] %vm420_vm0, %v717_v16 }
 0x2bd   : > { %v732_v18 = vld [vmem:[#allocation4] sm:$0xff] }
 0x2be   : > { %v764_v19 = vmul.f32 %v747_v17, %v732_v18 }
 0x2c0   : > { %768 = vst.msk [vmem:[#allocation5] sm:$0xff] %vm420_vm0, %v764_v19 }
 0x2e8   : > { %v771_v20 = vpop.permute.xlu2 %770 }
 0x2e9   : > { %774 = vst.msk [vmem:[#allocation5] sm:$0xff] %vm773_vm3, %v771_v20 }
 0x308   : > { %v783_v24 = vpop.permute.xlu0 %782 }
 0x31e   : > { %v777_v23 = vpop.permute.xlu1 %776 }
 0x31f   : > { %780 = vst.msk [vmem:[#allocation5] sm:$0xff] %vm779_vm4, %v777_v23 }
 0x320   : > { %786 = vst.msk [vmem:[#allocation5] sm:$0xff] %vm785_vm5, %v783_v24 }
 0x327   : > { %v787_v25 = vld [vmem:[#allocation5] sm:$0xff] }
 0x328   : > { %v788_v26 = vpack.c.bf16 %v787_v25, %v787_v25 }
 0x32a   : > { %1025 = vmatmul.msk.bf16.vlgmr.msra.gmra.mxu0 %vm809_vm6, %v788_v26 }
 0x3a7   : > { %v822_v28 = vpop.f32.mrf.mxu0 }
 0x3a8   : > { %v823_v29 = vadd.f32 %v1119_v27, %v822_v28 }
 0x3aa   : > { %826 = vst.msk [vmem:[%s381_s12] sm:$0xff] %vm809_vm6, %v823_v29 }
 0x3ab   : > { %1231 = shalt.err (!%p1228_p0)
}
 0x3ac   : > { %1041 = dma.vmem_to_hbm [thread:$0]  (%p1407_p4), %s842_s13, 128, %s844_s18, %s828_s15  }
 0x3af   : > { %v824_v30 = vpop.f32.mrf.mxu0 }
 0x3b0 PF: > { %s855_s4 = sand.u32 1, %s1270_s21   ;;  %p1052_p2 = pnand %p996_p6, %p1415_p7 }
 0x3b1   : > { %s856_s11 = scalar_lea.sflag [#allocation8], %s855_s4 }
 0x3b2   : > { %p1053_p5 = pneg %p1052_p2 }
 0x3b4   : > { %1265 = dma.done.wait (%p1053_p5), %s856_s11, 128  }
 0x3b5   : > { %1267 = vsyncadd (%p1053_p5), %s856_s11, 4294967168  ;;  %s23_s26 = sadd.s32 1, %s1290_s26   ;;  %s1613_s21 = smov %s1274_s22 }
 0x3b6   : > { %p20_p8 = scmp.ge.s32.totalorder %s23_s26, 4   ;;  %s1614_s22 = smov %s1278_s23 }
 0x3b7   : > { %s1615_s23 = smov %s1413_s20  ;;  %s1616_s24 = smov %s1286_s25 }
 0x3b8   : > { %s1617_s25 = smov %s1619_s14  ;;  %22 = sbr.rel (!%p20_p8) target bundleno = 9 (0x9), region = 110 }
 0x3bd   :  { %862 = vsyncpa [#allocation7], 1 }
 0x3be   :  { %864 = vsyncpa [#allocation7 + $0x1], 1 }
 0x3bf   :  { %865 = vsyncpa [#allocation10], 1 }
 0x3c0   :  { %866 = vsyncpa [#allocation8], 1 }
 0x3c1   :  { %868 = vsyncpa [#allocation8 + $0x1], 1 }

// kernel: decoder_attention.2
= control target key start
LH: loop header
LB: loop body
LE: loop exit
PB: predicated region body
PF: predicated region fallthrough
CT: control target
= control target key end

     0   :  { %11 = vsyncpa [#allocation3], 0  ;;  %s1043_s0 = inlined_call_operand.hbm [shape: f32[2,8,32], index: 0, kind: input, shape index: {}]   ;;  %s1044_s1 = inlined_call_operand.hbm [shape: bf16[32,96], index: 1, kind: input, shape index: {}]   ;;  %s1045_s2 = inlined_call_operand.vmem [shape: f32[1,96], index: 2, kind: input, shape index: {}]   ;;  %s1046_s3 = inlined_call_operand.vmem [shape: bf16[2,4,8,8], index: 3, kind: output, shape index: {0}]   ;;  %s1047_s4 = inlined_call_operand.vmem [shape: bf16[2,4,8,8], index: 4, kind: output, shape index: {1}]   ;;  %s1048_s5 = inlined_call_operand.vmem [shape: bf16[2,4,8,8], index: 5, kind: output, shape index: {2}]  }
   0x1   :  { %13 = vsyncpa [#allocation3 + $0x1], 0 }
   0x2   :  { %14 = vsyncpa [#allocation5], 0  ;;  %s897_s18 = smov 0   ;;  %s899_s19 = smov 0  }
   0x3   :  { %s901_s20 = smov 0   ;;  %s903_s21 = smov 0  }
   0x4   :  { %s905_s22 = smov 0   ;;  %s907_s23 = smov 0  }
   0x5 LB: > { %s616_s24 = sadd.s32 4294967295, %s851_s23   ;;  %p618_p0 = scmp.ge.s32.totalorder %s851_s23, 1  ;;  %s851_s23 = sphi %s907_s23, %s20_s23   ;;  %s847_s22 = sphi %s905_s22, %s1057_s22   ;;  %s843_s21 = sphi %s903_s21, %s1056_s21   ;;  %s839_s20 = sphi %s901_s20, %s1055_s20   ;;  %s835_s19 = sphi %s899_s19, %s1054_s19   ;;  %s831_s18 = sphi %s897_s18, %s1053_s18  }
   0x6   : > { %p929_p1 = scmp.eq.s32.totalorder %s616_s24, 0  ;;  %p191_p2 = scmp.lt.s32.totalorder %s851_s23, 3 }
   0x7   : > { %s202_s28 = sshll.u32 %s1044_s1, 4  ;;  %s853_s30 = smov [#allocation4]   ;;  %s203_s28 = int_to_ptr.hbm [resolvable:$true] %s202_s28 }
   0x8   : > { %p937_p3 = pnand %p618_p0, %p191_p2  ;;  %s204_s6 = sshll.u32 %s853_s30, 4  ;;  %s205_s6 = int_to_ptr.vmem [resolvable:$true] %s204_s6 }
   0x9   : > { %s854_s7 = smov 64   ;;  %s855_s8 = smov 4  }
   0xa   : > { %p663_p4 = pneg %p937_p3  ;;  %s32_s9 = sadd.s32 1, %s847_s22 }
   0xb   : > { %p34_p6 = scmp.ge.s32.totalorder %s32_s9, 2  ;;  %p48_p7 = scmp.ne.s32.totalorder %s839_s20, %s835_s19 }
   0xc   : > { %p664_p5 = pnand %p663_p4, %p929_p1  ;;  %p49_p8 = scmp.eq.s32.totalorder %s851_s23, 0 }
   0xd   : > { %s1059_s9 = smov (%p34_p6, %s32_s9), 0  ;;  %s41_s10 = sadd.s32 1, %s839_s20 }
   0xe   : > { %666 = dma.hbm_to_vmem [thread:$0]  (!%p664_p5), %s203_s28, 256, %s205_s6, [#allocation5], %s854_s7, %s854_s7, %s855_s8  }
   0xf   : > { %p54_p9 = scmp.ne.s32.totalorder %s835_s19, %s831_s18  ;;  %s36_s11 = ssub.s32 %s847_s22, %s1059_s9 }
  0x10   : > { %p956_p10 = por %p49_p8, %p48_p7  ;;  %p39_p11 = scmp.eq.s32.totalorder %s36_s11, 0 }
  0x11   : > { %p962_p12 = por %p929_p1, %p54_p9  ;;  %s221_s14 = sand.u32 1, %s839_s20  }
  0x12   : > { %s622_s15 = sshll.u32 %s847_s22, 3  ;;  %p672_p13 = scmp.lt.s32.totalorder %s851_s23, 2 }
  0x13   : > { %s969_s16 = scalar_select %p39_p11, %s839_s20, %s41_s10  }
  0x14   : > { %s621_s17 = sshll.u32 %s221_s14, 3  ;;  %s230_s26 = scalar_lea.hbm %s1043_s0, %s622_s15 }
  0x15   : > { %s232_s27 = sshll.u32 %s230_s26, 4  ;;  %s225_s28 = scalar_lea.vmem [#allocation2], %s621_s17  ;;  %s233_s27 = int_to_ptr.hbm [resolvable:$true] %s232_s27 }
  0x16   : > { %s234_s30 = sshll.u32 %s225_s28, 4  ;;  %p668_p0 = pnand %p672_p13, %p956_p10  ;;  %s235_s30 = int_to_ptr.vmem [resolvable:$true] %s234_s30 }
  0x17   : > { %s222_s6 = scalar_lea.sflag [#allocation3], %s221_s14  ;;  %243 = sbr.rel (%p937_p3) target bundleno = 310 (0x136), region = 32 }
  0x18   : > { %670 = dma.hbm_to_vmem [thread:$0]  (!%p668_p0), %s233_s27, 128, %s235_s30, %s222_s6  }
  0x19   : > { %s245_s7 = sand.u32 (!%p937_p3), 1, %s835_s19  }
  0x1a   : > { %s624_s8 = sshll.u32 (!%p937_p3), %s245_s7, 3  ;;  %s246_s10 = scalar_lea.sflag (!%p937_p3), [#allocation3], %s245_s7 }
  0x1b   : > { %s249_s11 = scalar_lea.vmem (!%p937_p3), [#allocation2], %s624_s8 }
  0x1c   : > { %822 = dma.done.wait (%p962_p12), %s246_s10, 128  }
  0x1d   : > { %824 = vsyncadd (%p962_p12), %s246_s10, 4294967168 }
  0x1e   : > { %826 = dma.done.wait (%p929_p1), [#allocation5], 256  }
  0x1f   : > { %828 = vsyncadd (%p929_p1), [#allocation5], 4294967040  ;;  %v656_v0 = vld [vmem:[#allocation4 + $0x8] sm:$0xff]  ;;  %v655_v1 = vld [vmem:[#allocation4] sm:$0xff]  ;;  %vm348_vm0 = vcmask 261120   ;;  %p301_p2 = scmp.lt.s32.totalorder %s843_s21, 1 }
  0x20   : > { %358 = vmatpush.bf16.msra.mxu0 %v656_v0  ;;  %v326_v2 = vld [vmem:[%s249_s11] sm:$0xff]  ;;  %vm366_vm1 = vcmask 60416   ;;  %s856_s17 = smov 56   ;;  %s857_s24 = smov 120  }
  0x21   : > { %v327_v3 = vpack.c.bf16 %v326_v2, %v326_v2  ;;  %s1061_s21 = smov (!%p301_p2, %s843_s21), 1  ;;  %v736_v4 = vld [vmem:[%s1045_s2] ss:$0 sm:$0xff]  ;;  %s858_s18 = smov 96  }
  0x22   : > { %s993_s13 = sshll.u32 %s1061_s21, 4  ;;  %s859_s21 = smov 112  }
  0x23   : > { %s999_s15 = scalar_lea.vmem %s1046_s3, %s993_s13  ;;  %s860_s26 = smov 88  }
  0x24   : > { %359 = vmatpush.bf16.msra.mxu0 %v655_v1  ;;  %s861_s27 = smov 64   ;;  %s862_s28 = smov 104  }
  0x25   : > { %s863_s30 = smov 48   ;;  %s864_s6 = smov 80  }
  0x26   : > { %s865_s7 = smov 40   ;;  %s866_s8 = smov 72  }
  0x27   : > { %640 = vmatmul.msk.bf16.vlgmr.msra.gmra.mxu0 %vm348_vm0, %v327_v3  ;;  %s324_s29 = scalar_lea.vmem %s1048_s5, %s993_s13  ;;  %s316_s14 = scalar_lea.vmem %s1047_s4, %s993_s13 }
  0xa4   : > { %v361_v5 = vpop.f32.mrf.mxu0 }
  0xa5   : > { %v362_v6 = vadd.f32 %v736_v4, %v361_v5 }
  0xa7   : > { %v365_v7 = vpack.c.bf16 %v362_v6, %v362_v6 }
  0xa9   : > { %387 = vrot.lane.b32.xlu2 %v365_v7, %s856_s17  ;;  %377 = vrot.lane.b32.xlu1 %v365_v7, %s857_s24  ;;  %367 = vst.msk [vmem:[%s999_s15] sm:$0xf] %vm366_vm1, %v365_v7 }
  0xaa   : > { %369 = vrot.lane.b32.xlu0 %v365_v7, %s858_s18 }
  0xac   : > { %v363_v8 = vpop.f32.mrf.mxu0 }
  0xb1   : > { %392 = vrot.lane.b32.xlu2 %v365_v7, %s859_s21  ;;  %382 = vrot.lane.b32.xlu1 %v365_v7, %s860_s26 }
  0xb2   : > { %373 = vrot.lane.b32.xlu0 %v365_v7, %s861_s27 }
  0xb9   : > { %407 = vrot.lane.b32.xlu2 %v365_v7, %s862_s28  ;;  %402 = vrot.lane.b32.xlu1 %v365_v7, %s863_s30 }
  0xba   : > { %397 = vrot.lane.b32.xlu0 %v365_v7, %s864_s6 }
  0xc1   : > { %417 = vrot.lane.b32.xlu1 %v365_v7, %s865_s7 }
  0xc2   : > { %412 = vrot.lane.b32.xlu0 %v365_v7, %s866_s8 }
 0x103   : > { %v388_v9 = vpop.permute.xlu2 %387 }
 0x104   : > { %643 = vst.msk [vmem:[%s324_s29 + $0x4] sm:$0xf] %vm366_vm1, %v388_v9 }
 0x10b   : > { %v393_v10 = vpop.permute.xlu2 %392 }
 0x10c   : > { %644 = vst.msk [vmem:[%s999_s15 + $0x8] sm:$0xf] %vm366_vm1, %v393_v10 }
 0x113   : > { %v408_v11 = vpop.permute.xlu2 %407 }
 0x114   : > { %647 = vst.msk [vmem:[%s999_s15 + $0xc] sm:$0xf] %vm366_vm1, %v408_v11 }
 0x11b   : > { %v378_v12 = vpop.permute.xlu1 %377 }
 0x11c   : > { %641 = vst.msk [vmem:[%s999_s15 + $0x4] sm:$0xf] %vm366_vm1, %v378_v12  ;;  %v370_v13 = vpop.permute.xlu0 %369 }
 0x11d   : > { %372 = vst.msk [vmem:[%s316_s14] sm:$0xf] %vm366_vm1, %v370_v13 }
 0x123   : > { %v383_v14 = vpop.permute.xlu1 %382 }
 0x124   : > { %642 = vst.msk [vmem:[%s316_s14 + $0x4] sm:$0xf] %vm366_vm1, %v383_v14  ;;  %v374_v15 = vpop.permute.xlu0 %373 }
 0x125   : > { %376 = vst.msk [vmem:[%s324_s29] sm:$0xf] %vm366_vm1, %v374_v15 }
 0x12b   : > { %v403_v16 = vpop.permute.xlu1 %402 }
 0x12c   : > { %646 = vst.msk [vmem:[%s324_s29 + $0x8] sm:$0xf] %vm366_vm1, %v403_v16  ;;  %v398_v17 = vpop.permute.xlu0 %397 }
 0x12d   : > { %645 = vst.msk [vmem:[%s316_s14 + $0x8] sm:$0xf] %vm366_vm1, %v398_v17 }
 0x133   : > { %v418_v18 = vpop.permute.xlu1 %417 }
 0x134   : > { %649 = vst.msk [vmem:[%s324_s29 + $0xc] sm:$0xf] %vm366_vm1, %v418_v18  ;;  %v413_v19 = vpop.permute.xlu0 %412 }
 0x135   : > { %648 = vst.msk [vmem:[%s316_s14 + $0xc] sm:$0xf] %vm366_vm1, %v413_v19 }
 0x136 PF: > { %s20_s23 = sadd.s32 1, %s851_s23   ;;  %s1053_s18 = smov %s835_s19 }
 0x137   : > { %p17_p1 = scmp.ge.s32.totalorder %s20_s23, 4   ;;  %s1054_s19 = smov %s839_s20 }
 0x138   : > { %s1055_s20 = smov %s969_s16  ;;  %s1056_s21 = smov %s847_s22 }
 0x139   : > { %s1057_s22 = smov %s1059_s9  ;;  %19 = sbr.rel (!%p17_p1) target bundleno = 5 (0x5), region = 109 }
 0x13e   :  { %493 = vsyncpa [#allocation3], 1 }
 0x13f   :  { %495 = vsyncpa [#allocation3 + $0x1], 1 }
 0x140   :  { %496 = vsyncpa [#allocation5], 1 }

</bundles_post_ra>
